<compile_context>
chip_gen: v6e
topology: v6e:2x2x1
jax: 0.10.0
libtpu: 0.0.40
codegen_flags: <defaults>
</compile_context>

<pallas_src>
import functools

import jax
import jax.numpy as jnp
from jax.experimental import pallas as pl
from jax.experimental.pallas import tpu as pltpu

HIDDEN = 32      # hidden_units constructor arg of LaplaceNet
IN_DIM = 2       # (x, y) coordinates
OUT_DIM = 1      # scalar u(x, y)


def laplace_net_kernel(xy_ref, w1_ref, b1_ref, w2_ref, b2_ref, w3t_ref, b3_ref,
                       o_ref):
    """Fused MLP, batch in lanes.

    Layer 1 (K=2) runs on the VPU as two broadcast multiply-adds, layer 2 is a
    real (H,H) contraction on the MXU, and layer 3 (M=1) is a VPU multiply +
    sublane (XLU) reduction, so degenerate matmuls never touch the MXU and the
    critical path stays lane-dense on VPU/EUP.
    """
    x = xy_ref[...]                                            # (2, TN)
    w1 = w1_ref[...]                                           # (H, 2)

    # ---- layer 1: (H,2) @ (2,TN) as two broadcast FMAs on the VPU ----------
    h1 = jnp.tanh(w1[:, 0:1] * x[0:1, :]
                  + w1[:, 1:2] * x[1:2, :]
                  + b1_ref[...])                               # (H, TN)

    # ---- layer 2: full (H,H) contraction on the MXU ------------------------
    h2 = jnp.tanh(
        jnp.dot(w2_ref[...], h1, preferred_element_type=jnp.float32)
        + b2_ref[...])                                         # (H, TN)

    # ---- layer 3: (1,H) @ (H,TN) as VPU multiply + sublane reduce (XLU) ----
    out = jnp.sum(w3t_ref[...] * h2, axis=0, keepdims=True) + b3_ref[...]
    o_ref[...] = out.astype(o_ref.dtype)                       # (1, TN) lane-dense


def _pick_tile(n, requested):
    if requested is not None:
        assert n % requested == 0, "N must be a multiple of tile_n"
        return requested
    # Single lane-dense tile for small N (kills per-step overhead); otherwise
    # the largest 128-multiple tile (<= 4096) dividing N while keeping >= 2
    # grid steps so both v7x TensorCores get work.
    if n <= 256:
        return n
    for t in (4096, 2048, 1024, 512, 256, 128):
        if n % t == 0 and n // t >= 2:
            return t
    return n


@functools.partial(jax.jit, static_argnames=("tile_n",))
def laplace_net_forward(xy, w1, b1, w2, b2, w3, b3, *, tile_n=None):
    """xy: (N, 2) float32; weights/biases in PyTorch nn.Linear layout
    (w: (out, in), b: (out,)).  Returns u(x, y) with shape (N, 1)."""
    n, in_dim = xy.shape
    assert in_dim == IN_DIM
    hidden = w1.shape[0]
    tn = _pick_tile(n, tile_n)
    grid = (n // tn,)

    # Lane-dense layout plumbing (pure layout, done by XLA outside the kernel).
    xy_t = xy.T                               # (2, N)
    b1c = b1.reshape(hidden, 1)
    b2c = b2.reshape(hidden, 1)
    w3t = w3.reshape(OUT_DIM, hidden).T       # (H, 1)
    b3c = b3.reshape(OUT_DIM, 1)              # (1, 1)

    def full(shape):
        return pl.BlockSpec(shape, lambda i: tuple(0 for _ in shape))

    flops = 2 * n * (IN_DIM * hidden + hidden * hidden + hidden * OUT_DIM)
    bytes_accessed = 4 * (xy.size + n * OUT_DIM + w1.size + b1.size
                          + w2.size + b2.size + w3.size + b3.size)

    out_t = pl.pallas_call(
        laplace_net_kernel,
        out_shape=jax.ShapeDtypeStruct((OUT_DIM, n), jnp.float32),
        grid_spec=pltpu.PrefetchScalarGridSpec(
            num_scalar_prefetch=0,
            grid=grid,
            in_specs=[
                pl.BlockSpec((IN_DIM, tn), lambda i: (0, i)),   # xy, lane-dense
                full((hidden, IN_DIM)),                         # w1 (grid-invariant)
                full((hidden, 1)),                              # b1
                full((hidden, hidden)),                         # w2
                full((hidden, 1)),                              # b2
                full((hidden, OUT_DIM)),                        # w3.T
                full((OUT_DIM, 1)),                             # b3
            ],
            out_specs=pl.BlockSpec((OUT_DIM, tn), lambda i: (0, i)),
        ),
        compiler_params=pltpu.CompilerParams(
            dimension_semantics=("parallel",)),
        cost_estimate=pl.CostEstimate(
            flops=flops,
            transcendentals=2 * hidden * n,
            bytes_accessed=bytes_accessed),
    )(xy_t, w1, b1c, w2, b2c, w3t, b3c)

    return out_t.T                            # (N, 1)


def init_params(key, hidden=HIDDEN):
    """Deterministic PyTorch-Linear-style init (uniform +/- 1/sqrt(fan_in)),
    weights stored in PyTorch (out, in) layout, biases 1-D."""
    ks = jax.random.split(key, 6)

    def linear(kw, kb, fan_in, fan_out):
        bound = 1.0 / jnp.sqrt(jnp.float32(fan_in))
        w = jax.random.uniform(kw, (fan_out, fan_in), jnp.float32,
                               minval=-bound, maxval=bound)
        b = jax.random.uniform(kb, (fan_out,), jnp.float32,
                               minval=-bound, maxval=bound)
        return w, b

    w1, b1 = linear(ks[0], ks[1], IN_DIM, hidden)
    w2, b2 = linear(ks[2], ks[3], hidden, hidden)
    w3, b3 = linear(ks[4], ks[5], hidden, OUT_DIM)
    return w1, b1, w2, b2, w3, b3


def reference_forward(xy, w1, b1, w2, b2, w3, b3):
    """Pure-JAX reference with PyTorch nn.Linear semantics (x @ W.T + b)."""
    h1 = jnp.tanh(xy @ w1.T + b1)
    h2 = jnp.tanh(h1 @ w2.T + b2)
    return h2 @ w3.T + b3


if __name__ == "__main__":
    key = jax.random.PRNGKey(0)
    k_xy, k_params = jax.random.split(key)

    N = 128                                   # number of (x, y) sample points
    xy = jax.random.uniform(k_xy, (N, IN_DIM), jnp.float32)   # coords in [0,1)

    params = init_params(k_params)

    out = laplace_net_forward(xy, *params)
    out = jax.block_until_ready(out)

    ref = reference_forward(xy, *params)
    assert out.shape == (N, OUT_DIM)
    assert jnp.allclose(out, ref, atol=1e-5, rtol=1e-5), "mismatch vs reference"

    print("KERNEL_OK")
</pallas_src>

<mosaic_0001>
module attributes {stable_mosaic.version = 11 : i64} {
  func.func @laplace_net_kernel(%arg0: i32, %arg1: memref<2x128xf32, #tpu.memory_space<vmem>>, %arg2: memref<32x2xf32, #tpu.memory_space<vmem>>, %arg3: memref<32x1xf32, #tpu.memory_space<vmem>>, %arg4: memref<32x32xf32, #tpu.memory_space<vmem>>, %arg5: memref<32x1xf32, #tpu.memory_space<vmem>>, %arg6: memref<32x1xf32, #tpu.memory_space<vmem>>, %arg7: memref<1x1xf32, #tpu.memory_space<vmem>>, %arg8: memref<1x128xf32, #tpu.memory_space<vmem>>) attributes {dimension_semantics = [#tpu.dimension_semantics<parallel>], iteration_bounds = array<i64: 1>, scalar_prefetch = 0 : i64, scratch_operands = 0 : i64, tpu.core_type = #tpu.core_type<tc>, window_params = [{transform_indices = @transform_0, window_bounds = array<i64: 2, 128>}, {pipeline_mode = #tpu.pipeline_mode<synchronous>, transform_indices = @transform_1, window_bounds = array<i64: 32, 2>}, {pipeline_mode = #tpu.pipeline_mode<synchronous>, transform_indices = @transform_2, window_bounds = array<i64: 32, 1>}, {pipeline_mode = #tpu.pipeline_mode<synchronous>, transform_indices = @transform_3, window_bounds = array<i64: 32, 32>}, {pipeline_mode = #tpu.pipeline_mode<synchronous>, transform_indices = @transform_4, window_bounds = array<i64: 32, 1>}, {pipeline_mode = #tpu.pipeline_mode<synchronous>, transform_indices = @transform_5, window_bounds = array<i64: 32, 1>}, {pipeline_mode = #tpu.pipeline_mode<synchronous>, transform_indices = @transform_6, window_bounds = array<i64: 1, 1>}, {transform_indices = @transform_7, window_bounds = array<i64: 1, 128>}]} {
    %c0 = arith.constant 0 : index
    %c0_0 = arith.constant 0 : index
    %0 = vector.load %arg1[%c0, %c0_0] : memref<2x128xf32, #tpu.memory_space<vmem>>, vector<2x128xf32>
    %c0_1 = arith.constant 0 : index
    %c0_2 = arith.constant 0 : index
    %1 = vector.load %arg2[%c0_1, %c0_2] : memref<32x2xf32, #tpu.memory_space<vmem>>, vector<32x2xf32>
    %2 = vector.extract_strided_slice %1 {offsets = [0, 0], sizes = [32, 1], strides = [1, 1]} : vector<32x2xf32> to vector<32x1xf32>
    %3 = vector.extract_strided_slice %0 {offsets = [0, 0], sizes = [1, 128], strides = [1, 1]} : vector<2x128xf32> to vector<1x128xf32>
    %4 = vector.broadcast %2 : vector<32x1xf32> to vector<32x128xf32>
    %5 = vector.broadcast %3 : vector<1x128xf32> to vector<32x128xf32>
    %6 = arith.mulf %4, %5 : vector<32x128xf32>
    %7 = vector.extract_strided_slice %1 {offsets = [0, 1], sizes = [32, 1], strides = [1, 1]} : vector<32x2xf32> to vector<32x1xf32>
    %8 = vector.extract_strided_slice %0 {offsets = [1, 0], sizes = [1, 128], strides = [1, 1]} : vector<2x128xf32> to vector<1x128xf32>
    %9 = vector.broadcast %7 : vector<32x1xf32> to vector<32x128xf32>
    %10 = vector.broadcast %8 : vector<1x128xf32> to vector<32x128xf32>
    %11 = arith.mulf %9, %10 : vector<32x128xf32>
    %12 = arith.addf %6, %11 : vector<32x128xf32>
    %c0_3 = arith.constant 0 : index
    %c0_4 = arith.constant 0 : index
    %13 = vector.load %arg3[%c0_3, %c0_4] : memref<32x1xf32, #tpu.memory_space<vmem>>, vector<32x1xf32>
    %14 = vector.broadcast %13 : vector<32x1xf32> to vector<32x128xf32>
    %15 = arith.addf %12, %14 : vector<32x128xf32>
    %16 = math.tanh %15 : vector<32x128xf32>
    %c0_5 = arith.constant 0 : index
    %c0_6 = arith.constant 0 : index
    %17 = vector.load %arg4[%c0_5, %c0_6] : memref<32x32xf32, #tpu.memory_space<vmem>>, vector<32x32xf32>
    %cst = arith.constant dense<0.000000e+00> : vector<32x128xf32>
    %18 = tpu.matmul %17, %16, %cst {dimension_numbers = #tpu.dot_dimension_numbers<[1], [0], [0], [1], [0, 0, 1, 1], [], []>} : vector<32x32xf32>, vector<32x128xf32>, vector<32x128xf32> -> vector<32x128xf32>
    %c0_7 = arith.constant 0 : index
    %c0_8 = arith.constant 0 : index
    %19 = vector.load %arg5[%c0_7, %c0_8] : memref<32x1xf32, #tpu.memory_space<vmem>>, vector<32x1xf32>
    %20 = vector.broadcast %19 : vector<32x1xf32> to vector<32x128xf32>
    %21 = arith.addf %18, %20 : vector<32x128xf32>
    %22 = math.tanh %21 : vector<32x128xf32>
    %c0_9 = arith.constant 0 : index
    %c0_10 = arith.constant 0 : index
    %23 = vector.load %arg6[%c0_9, %c0_10] : memref<32x1xf32, #tpu.memory_space<vmem>>, vector<32x1xf32>
    %24 = vector.broadcast %23 : vector<32x1xf32> to vector<32x128xf32>
    %25 = arith.mulf %24, %22 : vector<32x128xf32>
    %cst_11 = arith.constant dense<0.000000e+00> : vector<128xf32>
    %26 = vector.multi_reduction <add>, %25, %cst_11 [0] : vector<32x128xf32> to vector<128xf32>
    %27 = vector.shape_cast %26 : vector<128xf32> to vector<1x128xf32>
    %c0_12 = arith.constant 0 : index
    %c0_13 = arith.constant 0 : index
    %28 = vector.load %arg7[%c0_12, %c0_13] : memref<1x1xf32, #tpu.memory_space<vmem>>, vector<1x1xf32>
    %29 = vector.broadcast %28 : vector<1x1xf32> to vector<1x128xf32>
    %30 = arith.addf %27, %29 : vector<1x128xf32>
    %c0_14 = arith.constant 0 : index
    %c0_15 = arith.constant 0 : index
    %31 = vector.load %arg8[%c0_14, %c0_15] : memref<1x128xf32, #tpu.memory_space<vmem>>, vector<1x128xf32>
    tpu.vector_store %arg8[%c0_14, %c0_15], %30 {strides = array<i32>} : memref<1x128xf32, #tpu.memory_space<vmem>>, vector<1x128xf32>,
    return
  }
  func.func @transform_0(%arg0: i32) -> (i32, i32) {
    %c0_i32 = arith.constant 0 : i32
    %c0_i32_0 = arith.constant 0 : i32
    return %c0_i32, %arg0 : i32, i32
  }
  func.func @transform_1(%arg0: i32) -> (i32, i32) {
    %c0_i32 = arith.constant 0 : i32
    %c0_i32_0 = arith.constant 0 : i32
    %c0_i32_1 = arith.constant 0 : i32
    return %c0_i32, %c0_i32_0 : i32, i32
  }
  func.func @transform_2(%arg0: i32) -> (i32, i32) {
    %c0_i32 = arith.constant 0 : i32
    %c0_i32_0 = arith.constant 0 : i32
    %c0_i32_1 = arith.constant 0 : i32
    return %c0_i32, %c0_i32_0 : i32, i32
  }
  func.func @transform_3(%arg0: i32) -> (i32, i32) {
    %c0_i32 = arith.constant 0 : i32
    %c0_i32_0 = arith.constant 0 : i32
    %c0_i32_1 = arith.constant 0 : i32
    return %c0_i32, %c0_i32_0 : i32, i32
  }
  func.func @transform_4(%arg0: i32) -> (i32, i32) {
    %c0_i32 = arith.constant 0 : i32
    %c0_i32_0 = arith.constant 0 : i32
    %c0_i32_1 = arith.constant 0 : i32
    return %c0_i32, %c0_i32_0 : i32, i32
  }
  func.func @transform_5(%arg0: i32) -> (i32, i32) {
    %c0_i32 = arith.constant 0 : i32
    %c0_i32_0 = arith.constant 0 : i32
    %c0_i32_1 = arith.constant 0 : i32
    return %c0_i32, %c0_i32_0 : i32, i32
  }
  func.func @transform_6(%arg0: i32) -> (i32, i32) {
    %c0_i32 = arith.constant 0 : i32
    %c0_i32_0 = arith.constant 0 : i32
    %c0_i32_1 = arith.constant 0 : i32
    return %c0_i32, %c0_i32_0 : i32, i32
  }
  func.func @transform_7(%arg0: i32) -> (i32, i32) {
    %c0_i32 = arith.constant 0 : i32
    %c0_i32_0 = arith.constant 0 : i32
    return %c0_i32, %arg0 : i32, i32
  }
}

</mosaic_0001>

<bundles_post_ra>
// kernel: laplace_net_forward.1
= control target key start
LH: loop header
LB: loop body
LE: loop exit
PB: predicated region body
PF: predicated region fallthrough
CT: control target
= control target key end

     0   :  { %s521_s0 = inlined_call_operand.vmem [shape: f32[2,128], index: 0, kind: input, shape index: {}]   ;;  %s522_s1 = inlined_call_operand.vmem [shape: f32[32,2], index: 1, kind: input, shape index: {}]   ;;  %s523_s2 = inlined_call_operand.vmem [shape: f32[32,1], index: 2, kind: input, shape index: {}]   ;;  %s524_s3 = inlined_call_operand.vmem [shape: f32[32,32], index: 3, kind: input, shape index: {}]   ;;  %s525_s4 = inlined_call_operand.vmem [shape: f32[32,1], index: 4, kind: input, shape index: {}]   ;;  %s526_s5 = inlined_call_operand.vmem [shape: f32[32,1], index: 5, kind: input, shape index: {}]   ;;  %s527_s6 = inlined_call_operand.<no memory space> [shape: f32[1,1], index: 6, kind: input, shape index: {}]   ;;  %s528_s7 = inlined_call_operand.hbm [shape: f32[1,128], index: 7, kind: output, shape index: {}]  }
   0x1   :  { %v12_v0 = vstv %s527_s6 }
   0x2   :  { %13 = vst [vmem:[#allocation2] sm:$0x1] %v12_v0 }
   0x3   :  { %v33_v1 = vld [vmem:[%s522_s1 + $0x18] sm:$0xff]  ;;  %v32_v2 = vld [vmem:[%s522_s1 + $0x10] sm:$0xff]  ;;  %v397_v3 = vmov 1   ;;  %v398_v4 = vmov 0   ;;  %v31_v5 = vld [vmem:[%s522_s1 + $0x8] sm:$0xff] }
   0x4   :  { %352 = vset.pattern.permute.xlu0 %v397_v3  ;;  %353 = vset.pattern.permute.xlu1 %v398_v4 }
   0x5   :  { %75 = vperm.xlu0 %352, %v33_v1   ;;  %46 = vperm.xlu1 %353, %v32_v2  }
   0x9   :  { %354 = vset.pattern.permute.xlu1 %v397_v3  ;;  %67 = vperm.xlu0 %352, %v31_v5  }
   0xa   :  { %14 = vsyncpa [#allocation4], 0  ;;  %71 = vperm.xlu1 %354, %v32_v2   ;;  %v30_v6 = vld [vmem:[%s522_s1] sm:$0xff]  ;;  %v93_v7 = vld [vmem:[%s523_s2 + $0x18] sm:$0xff]  ;;  %vm150_vm0 = vcmask 261120   ;;  %v54_v22 = vlaneseq }
   0xb   :  { %v91_v8 = vld [vmem:[%s523_s2 + $0x8] sm:$0xff]  ;;  %v126_v9 = vld [vmem:[%s525_s4] sm:$0xff]  ;;  %v92_v10 = vld [vmem:[%s523_s2 + $0x10] sm:$0xff] }
   0xc   :  { %v128_v11 = vld [vmem:[%s525_s4 + $0x10] sm:$0xff]  ;;  %v90_v12 = vld [vmem:[%s523_s2] sm:$0xff]  ;;  %v127_v14 = vld [vmem:[%s525_s4 + $0x8] sm:$0xff]  ;;  %v499_v23 = vshrl.u32 %v54_v22, 7 }
   0xd   :  { %356 = vset.pattern.permute.xlu0 %v398_v4  ;;  %v252_v13 = vld [vmem:[%s526_s5] sm:$0xff]  ;;  %v254_v15 = vld [vmem:[%s526_s5 + $0x10] sm:$0xff]  ;;  %v129_v16 = vld [vmem:[%s525_s4 + $0x18] sm:$0xff] }
   0xe   :  { %355 = vset.pattern.permute.xlu1 %v398_v4  ;;  %51 = vperm.xlu0 %356, %v33_v1   ;;  %v289_v17 = vld [vmem:[#allocation2] sm:$0x1]  ;;  %v253_v18 = vld [vmem:[%s526_s5 + $0x8] sm:$0xff]  ;;  %v124_v20 = vld [vmem:[%s524_s3 + $0x10] sm:$0xff]  ;;  %v80_v26 = vsub.s32 1, %v499_v23  ;;  %v56_v27 = vsub.s32 0, %v499_v23 }
   0xf   :  { %41 = vperm.xlu1 %355, %v31_v5   ;;  %v122_v19 = vld [vmem:[%s524_s3] sm:$0xff]  ;;  %v255_v21 = vld [vmem:[%s526_s5 + $0x18] sm:$0xff]  ;;  %338 = vmatprep.mubr.msk.f32.mxu1 %vm150_vm0, %v124_v20  ;;  %v123_v61 = vld [vmem:[%s524_s3 + $0x8] sm:$0xff] }
  0x10   :  { %335 = vmatprep.mubr.msk.f32.mxu0 %vm150_vm0, %v122_v19  ;;  %v29_v29 = vld [vmem:[%s521_s0] sm:$0x3]  ;;  %v125_v62 = vld [vmem:[%s524_s3 + $0x18] sm:$0xff]  ;;  %s399_s3 = smov [#allocation3]  }
  0x11   :  { %v81_v31 = vrot.slane %v29_v29, %v80_v26  ;;  %v57_v32 = vrot.slane %v29_v29, %v56_v27  ;;  %s307_s15 = sshll.u32 %s399_s3, 4  ;;  %s308_s15 = int_to_ptr.vmem [resolvable:$true] %s307_s15 }
  0x12   :  { %36 = vperm.xlu0 %356, %v30_v6   ;;  %s375_s16 = scalar_lea.vmem %s308_s15, 16  ;;  %s379_s1 = scalar_lea.vmem %s308_s15, 32 }
  0x13   :  { %111 = vperm.xlu1 %355, %v93_v7   ;;  %p376_p0 = scmp.ne.s32.totalorder %s308_s15, %s375_s16  ;;  %p380_p1 = scmp.lt.s32.totalorder %s308_s15, %s308_s15 }
  0x14   :  { %p381_p2 = scmp.lt.s32.totalorder %s379_s1, %s375_s16 }
  0x16   :  { %101 = vperm.xlu0 %356, %v91_v8   ;;  %p382_p3 = por %p381_p2, %p380_p1 }
  0x17   :  { %357 = vset.pattern.permute.xlu1 %v397_v3 }
  0x18   :  { %63 = vperm.xlu1 %357, %v30_v6   ;;  %p383_p4 = pnand %p382_p3, %p376_p0 }
  0x1a   :  { %132 = vperm.xlu0 %356, %v126_v9  }
  0x1c   :  { %358 = vset.pattern.permute.xlu1 %v398_v4 }
  0x1d   :  { %106 = vperm.xlu1 %358, %v92_v10  }
  0x1e   :  { %142 = vperm.xlu0 %356, %v128_v11  }
  0x21   :  { %96 = vperm.xlu1 %358, %v90_v12  }
  0x22   :  { %258 = vperm.xlu0 %356, %v252_v13  }
  0x25   :  { %137 = vperm.xlu1 %358, %v127_v14  }
  0x26   :  { %268 = vperm.xlu0 %356, %v254_v15  }
  0x29   :  { %147 = vperm.xlu1 %358, %v129_v16  }
  0x2a   :  { %292 = vperm.xlu0 %356, %v289_v17  }
  0x2d   :  { %263 = vperm.xlu1 %358, %v253_v18  }
  0x31   :  { %273 = vperm.xlu1 %358, %v255_v21  }
  0x80   :  { %v47_v24 = vpop.permute.xlu1 %46  ;;  %v76_v25 = vpop.permute.xlu0 %75 }
  0x81   :  { %v85_v33 = vmul.f32 %v81_v31, %v76_v25  ;;  %v60_v45 = vmul.f32 %v57_v32, %v47_v24 }
  0x84   :  { %v68_v28 = vpop.permute.xlu0 %67 }
  0x85   :  { %v72_v30 = vpop.permute.xlu1 %71  ;;  %v83_v42 = vmul.f32 %v81_v31, %v68_v28 }
  0x86   :  { %v84_v41 = vmul.f32 %v81_v31, %v72_v30 }
  0x88   :  { %v88_v50 = vadd.f32 %v84_v41, %v60_v45 }
  0x89   :  { %v52_v34 = vpop.permute.xlu0 %51 }
  0x8a   :  { %v61_v35 = vmul.f32 %v57_v32, %v52_v34  ;;  %v42_v36 = vpop.permute.xlu1 %41 }
  0x8b   :  { %v59_v43 = vmul.f32 %v57_v32, %v42_v36 }
  0x8c   :  { %v89_v37 = vadd.f32 %v85_v33, %v61_v35 }
  0x8d   :  { %v37_v40 = vpop.permute.xlu0 %36  ;;  %v87_v48 = vadd.f32 %v83_v42, %v59_v43 }
  0x8e   :  { %v112_v38 = vpop.permute.xlu1 %111  ;;  %v58_v47 = vmul.f32 %v57_v32, %v37_v40 }
  0x8f   :  { %v117_v39 = vadd.f32 %v112_v38, %v89_v37 }
  0x91   :  { %359 = vtanh.f32 %v117_v39  ;;  %v102_v46 = vpop.permute.xlu0 %101 }
  0x92   :  { %v115_v52 = vadd.f32 %v102_v46, %v87_v48 }
  0x93   :  { %v64_v44 = vpop.permute.xlu1 %63 }
  0x94   :  { %v82_v49 = vmul.f32 %v81_v31, %v64_v44 }
  0x95   :  { %v133_v63 = vpop.permute.xlu0 %132 }
  0x96   :  { %v86_v54 = vadd.f32 %v82_v49, %v58_v47 }
  0x98   :  { %v107_v51 = vpop.permute.xlu1 %106 }
  0x99   :  { %v116_v53 = vadd.f32 %v107_v51, %v88_v50  ;;  %v143_v3 = vpop.permute.xlu0 %142 }
  0x9b   :  { %361 = vtanh.f32 %v116_v53 }
  0x9c   :  { %v97_v55 = vpop.permute.xlu1 %96  ;;  %363 = vtanh.f32 %v115_v52 }
  0x9d   :  { %v114_v56 = vadd.f32 %v97_v55, %v86_v54  ;;  %v259_v11 = vpop.permute.xlu0 %258 }
  0x9e   :  { %v360_v57 = vpop.eup %359 }
  0x9f   :  { %365 = vtanh.f32 %v114_v56  ;;  %327 = vmatprep.subr.mxu0 %v360_v57  ;;  %341 = vmatprep.subr.mxu1 %v360_v57 }
  0xa0   :  { %328 = vmatpush3.msra.mxu0 %v360_v57  ;;  %345 = vmatpush3.msra.mxu1 %v360_v57  ;;  %v138_v0 = vpop.permute.xlu1 %137 }
  0xa1   :  { %v269_v19 = vpop.permute.xlu0 %268 }
  0xa4   :  { %v148_v4 = vpop.permute.xlu1 %147 }
  0xa5   :  { %v293_v32 = vpop.permute.xlu0 %292 }
  0xa6   :  { %v298_v34 = vrot.slane %v293_v32, %v56_v27 }
  0xa8   :  { %v362_v58 = vpop.eup %361  ;;  %v264_v13 = vpop.permute.xlu1 %263 }
  0xa9   :  { %329 = vmatprep.subr.mxu0 %v362_v58  ;;  %342 = vmatprep.subr.mxu1 %v362_v58  ;;  %v364_v59 = vpop.eup %363 }
  0xaa   :  { %330 = vmatpush3.msra.mxu0 %v362_v58  ;;  %346 = vmatpush3.msra.mxu1 %v362_v58 }
  0xab   :  { %331 = vmatprep.subr.mxu0 %v364_v59  ;;  %343 = vmatprep.subr.mxu1 %v364_v59 }
  0xac   :  { %v366_v60 = vpop.eup %365  ;;  %332 = vmatpush3.msra.mxu0 %v364_v59  ;;  %347 = vmatpush3.msra.mxu1 %v364_v59  ;;  %v274_v22 = vpop.permute.xlu1 %273 }
  0xad   :  { %333 = vmatprep.subr.mxu0 %v366_v60  ;;  %344 = vmatprep.subr.mxu1 %v366_v60 }
  0xae   :  { %334 = vmatpush3.msra.mxu0 %v366_v60  ;;  %348 = vmatpush3.msra.mxu1 %v366_v60 }
  0xaf   :  { %336 = vmatmul.mubr.msk.f32.vlgmr.msra.gmra.mxu0 %vm150_vm0, %v123_v61  ;;  %339 = vmatmul.mubr.msk.f32.vlgmr.msra.gmra.mxu1 %vm150_vm0, %v125_v62 }
 0x16f   :  { %v337_v1 = vpop.f32.mrf.mxu0  ;;  %v340_v2 = vpop.f32.mrf.mxu1 }
 0x170   :  { %v235_v5 = vadd.f32 %v337_v1, %v138_v0  ;;  %v245_v8 = vadd.f32 %v340_v2, %v148_v4 }
 0x171   :  { %v229_v6 = vpop.f32.mrf.mxu0  ;;  %v239_v7 = vpop.f32.mrf.mxu1 }
 0x172   :  { %367 = vtanh.f32 %v235_v5  ;;  %v230_v9 = vadd.f32 %v229_v6, %v133_v63  ;;  %v240_v10 = vadd.f32 %v239_v7, %v143_v3 }
 0x174   :  { %369 = vtanh.f32 %v230_v9 }
 0x175   :  { %371 = vtanh.f32 %v240_v10 }
 0x176   :  { %373 = vtanh.f32 %v245_v8 }
 0x17f   :  { %v368_v12 = vpop.eup %367 }
 0x180   :  { %v277_v16 = vmul.f32 %v368_v12, %v264_v13 }
 0x181   :  { %v370_v14 = vpop.eup %369 }
 0x182   :  { %v372_v15 = vpop.eup %371  ;;  %v276_v17 = vmul.f32 %v370_v14, %v259_v11 }
 0x183   :  { %v374_v18 = vpop.eup %373  ;;  %v278_v20 = vmul.f32 %v372_v15, %v269_v19 }
 0x184   :  { %v280_v21 = vadd.f32 %v277_v16, %v276_v17  ;;  %v279_v24 = vmul.f32 %v374_v18, %v274_v22 }
 0x186   :  { %v281_v25 = vadd.f32 %v280_v21, %v278_v20 }
 0x188   :  { %v282_v26 = vadd.f32 %v281_v25, %v279_v24 }
 0x18a   :  { %v283_v28 = vrot.slane %v282_v26, 4 }
 0x18c   :  { %v284_v29 = vadd.f32 %v283_v28, %v282_v26 }
 0x18e   :  { %v285_v30 = vrot.slane %v284_v29, 2 }
 0x190   :  { %v286_v31 = vadd.f32 %v285_v30, %v284_v29 }
 0x192   :  { %v287_v33 = vrot.slane %v286_v31, 1 }
 0x194   :  { %v288_v35 = vadd.f32 %v287_v33, %v286_v31 }
 0x196   :  { %v299_v36 = vadd.f32 %v298_v34, %v288_v35 }
 0x198   :  { %300 = vst [vmem:[#allocation3] sm:$0x1] %v299_v36 }
 0x199   :  { %386 = shalt.err (!%p383_p4)
}
 0x19a   :  { %310 = dma.vmem_to_hbm [thread:$0]  %s308_s15, 16, %s528_s7, [#allocation4]  }
 0x19b   :  { %395 = dma.done.wait [#allocation4], 16  }
 0x19c   :  { %396 = vsyncadd [#allocation4], 4294967280 }
 0x19d   :  { %314 = vsyncpa [#allocation4], 1 }

</bundles_post_ra>
